<compile_context>
chip_gen: v6e
topology: v6e:2x2x1
jax: 0.10.0
libtpu: 0.0.40
codegen_flags: <defaults>
</compile_context>

<pallas_src>
import math

import jax
import jax.numpy as jnp
from jax import lax
from jax.experimental import pallas as pl
from jax.experimental.pallas import tpu as pltpu  # noqa: F401  (kept for TPU backend use)

# ---- problem sizes (small, consistent with the module) ----
B, S, H = 2, 8, 32          # batch, latent sequence, d_new
NH = 4                      # nh_latent
DH = H // NH                # head dim
FF = 64                     # ff_hidden
EPS = 1e-5                  # torch.nn.LayerNorm default eps
BS = B * S                  # flattened token count


def _layer_norm(x, g, b):
    mu = jnp.mean(x, axis=-1, keepdims=True)
    var = jnp.mean((x - mu) ** 2, axis=-1, keepdims=True)
    return (x - mu) * lax.rsqrt(var + EPS) * g + b


def _gelu_exact(x):
    # exact (erf) GELU, matching torch.nn.GELU() default
    return 0.5 * x * (1.0 + lax.erf(x / math.sqrt(2.0)))


def latent_layer_kernel(z_ref, bias_ref, pvec_ref,
                        wqkv_ref, wo_ref, w1_ref, w2_ref,
                        out_ref):
    z = z_ref[...]                    # (BS, H)  -- all batches at once
    bias = bias_ref[...]              # (BS, BS) additive attention bias
                                      # (block-diag over batches + pad mask)

    # packed 1-row parameters (single (8,128) tile)
    ln1_g = pvec_ref[0:1, 0:H]
    ln1_b = pvec_ref[1:2, 0:H]
    ln2_g = pvec_ref[2:3, 0:H]
    ln2_b = pvec_ref[3:4, 0:H]
    bo    = pvec_ref[4:5, 0:H]
    b2    = pvec_ref[5:6, 0:H]
    bqkv  = pvec_ref[6:7, 0:3 * H]    # Q part already pre-scaled by 1/sqrt(DH)
    b1    = pvec_ref[7:8, 0:FF]

    # ---------- attention branch:  z + attn(ln1(z)) ----------
    h1 = _layer_norm(z, ln1_g, ln1_b)
    qkv = jnp.dot(h1, wqkv_ref[...], preferred_element_type=jnp.float32) + bqkv

    attn = None
    for h in range(NH):               # static unroll over heads (NH small)
        q = qkv[:, h * DH:(h + 1) * DH]
        k = qkv[:, H + h * DH: H + (h + 1) * DH]
        v = qkv[:, 2 * H + h * DH: 2 * H + (h + 1) * DH]
        # q @ k.T without an explicit transpose; scale already folded into Wqkv
        s = lax.dot_general(q, k, (((1,), (1,)), ((), ())),
                            preferred_element_type=jnp.float32) + bias
        s = s - jnp.max(s, axis=-1, keepdims=True)
        p = jnp.exp(s)
        p = p * pl.reciprocal(jnp.sum(p, axis=-1, keepdims=True), approx=False)
        hv = jnp.dot(p, v, preferred_element_type=jnp.float32)          # (BS, DH)
        # fold Wo into the head loop: accumulate hv @ Wo[h*DH:(h+1)*DH, :]
        contrib = jnp.dot(hv, wo_ref[h * DH:(h + 1) * DH, :],
                          preferred_element_type=jnp.float32)
        attn = contrib if attn is None else attn + contrib
    z = z + attn + bo                 # drop1 is identity in eval mode

    # ---------- MLP branch:  z + mlp(ln2(z)) ----------
    h2 = _layer_norm(z, ln2_g, ln2_b)
    m = jnp.dot(h2, w1_ref[...], preferred_element_type=jnp.float32) + b1
    m = _gelu_exact(m)
    m = jnp.dot(m, w2_ref[...], preferred_element_type=jnp.float32) + b2
    out_ref[...] = z + m              # drop2 is identity in eval mode


def latent_layer(z, pad_mask, p):
    """z: (B,S,H) float32, pad_mask: (B,S) bool (True = padded)."""
    zf = z.reshape(BS, H)

    # Block-diagonal additive bias over the flattened token axis.
    # bias[i, j] = 0 if tokens i, j are in the same batch AND key j is valid,
    # else -1e9.  This makes the flat (BS, BS) attention equal per-batch attention.
    valid = 1.0 - pad_mask.astype(jnp.float32)            # (B, S), 1 = valid key
    key_valid = valid.reshape(BS)
    bidx = jnp.arange(BS, dtype=jnp.int32) // S
    same = bidx[:, None] == bidx[None, :]
    bias = jnp.where(same & (key_valid[None, :] > 0.5), 0.0, -1e9).astype(jnp.float32)

    # Fold 1/sqrt(DH) into the Q columns of Wqkv / bqkv (removes per-head scale).
    scale = 1.0 / math.sqrt(DH)
    qscale = jnp.concatenate([jnp.full((H,), scale, jnp.float32),
                              jnp.ones((2 * H,), jnp.float32)])
    wqkv = p["wqkv"] * qscale[None, :]
    bqkv = p["bqkv"].reshape(3 * H) * qscale

    # Pack the eight tiny 1-row parameter vectors into one (8, 128) tile.
    pvec = jnp.zeros((8, 128), jnp.float32)
    pvec = pvec.at[0, :H].set(p["ln1_g"].reshape(H))
    pvec = pvec.at[1, :H].set(p["ln1_b"].reshape(H))
    pvec = pvec.at[2, :H].set(p["ln2_g"].reshape(H))
    pvec = pvec.at[3, :H].set(p["ln2_b"].reshape(H))
    pvec = pvec.at[4, :H].set(p["bo"].reshape(H))
    pvec = pvec.at[5, :H].set(p["b2"].reshape(H))
    pvec = pvec.at[6, :3 * H].set(bqkv)
    pvec = pvec.at[7, :FF].set(p["b1"].reshape(FF))

    out = pl.pallas_call(
        latent_layer_kernel,
        out_shape=jax.ShapeDtypeStruct((BS, H), jnp.float32),
        # no grid: single invocation, whole arrays resident in VMEM (< 100 KiB)
    )(zf, bias, pvec, wqkv, p["wo"], p["w1"], p["w2"])
    return out.reshape(B, S, H)


def ref_latent_layer(z, pad_mask, p):
    """Pure-JAX reference with identical math (for verification)."""
    valid = 1.0 - pad_mask.astype(jnp.float32)               # (B, S)

    def ln(x, g, b):
        mu = x.mean(-1, keepdims=True)
        var = ((x - mu) ** 2).mean(-1, keepdims=True)
        return (x - mu) / jnp.sqrt(var + EPS) * g + b

    h1 = ln(z, p["ln1_g"], p["ln1_b"])
    qkv = h1 @ p["wqkv"] + p["bqkv"]
    q, k, v = jnp.split(qkv, 3, axis=-1)
    q = q.reshape(B, S, NH, DH).transpose(0, 2, 1, 3)
    k = k.reshape(B, S, NH, DH).transpose(0, 2, 1, 3)
    v = v.reshape(B, S, NH, DH).transpose(0, 2, 1, 3)
    s = jnp.einsum("bhqd,bhkd->bhqk", q, k) / math.sqrt(DH)
    s = s + (1.0 - valid)[:, None, None, :] * (-1e9)
    a = jax.nn.softmax(s, axis=-1)
    o = jnp.einsum("bhqk,bhkd->bhqd", a, v).transpose(0, 2, 1, 3).reshape(B, S, H)
    o = o @ p["wo"] + p["bo"]
    z = z + o
    h2 = ln(z, p["ln2_g"], p["ln2_b"])
    m = jax.nn.gelu(h2 @ p["w1"] + p["b1"], approximate=False)
    m = m @ p["w2"] + p["b2"]
    return z + m


def make_params(key):
    ks = jax.random.split(key, 6)
    std = 0.02
    return {
        "ln1_g": jnp.ones((1, H), jnp.float32),
        "ln1_b": jnp.zeros((1, H), jnp.float32),
        "wqkv": std * jax.random.normal(ks[0], (H, 3 * H), jnp.float32),
        "bqkv": jnp.zeros((1, 3 * H), jnp.float32),
        "wo": std * jax.random.normal(ks[1], (H, H), jnp.float32),
        "bo": jnp.zeros((1, H), jnp.float32),
        "ln2_g": jnp.ones((1, H), jnp.float32),
        "ln2_b": jnp.zeros((1, H), jnp.float32),
        "w1": std * jax.random.normal(ks[2], (H, FF), jnp.float32),
        "b1": jnp.zeros((1, FF), jnp.float32),
        "w2": std * jax.random.normal(ks[3], (FF, H), jnp.float32),
        "b2": jnp.zeros((1, H), jnp.float32),
    }


if __name__ == "__main__":
    key = jax.random.PRNGKey(0)
    k_z, k_p = jax.random.split(key)
    z = jax.random.normal(k_z, (B, S, H), jnp.float32)
    # last two positions of batch 1 are padding
    pad_mask = jnp.zeros((B, S), jnp.bool_).at[1, -2:].set(True)
    params = make_params(k_p)

    out = jax.block_until_ready(latent_layer(z, pad_mask, params))
    ref = ref_latent_layer(z, pad_mask, params)

    assert out.shape == (B, S, H)
    assert jnp.allclose(out, ref, atol=1e-4, rtol=1e-4), float(jnp.max(jnp.abs(out - ref)))
    print("KERNEL_OK")
</pallas_src>

<mosaic_0001>
module attributes {stable_mosaic.version = 11 : i64} {
  func.func @latent_layer_kernel(%arg0: memref<16x32xf32, #tpu.memory_space<vmem>>, %arg1: memref<16x16xf32, #tpu.memory_space<vmem>>, %arg2: memref<8x128xf32, #tpu.memory_space<vmem>>, %arg3: memref<32x96xf32, #tpu.memory_space<vmem>>, %arg4: memref<32x32xf32, #tpu.memory_space<vmem>>, %arg5: memref<32x64xf32, #tpu.memory_space<vmem>>, %arg6: memref<64x32xf32, #tpu.memory_space<vmem>>, %arg7: memref<16x32xf32, #tpu.memory_space<vmem>>) attributes {dimension_semantics = [], scalar_prefetch = 0 : i64, scratch_operands = 0 : i64, tpu.core_type = #tpu.core_type<tc>} {
    %c0 = arith.constant 0 : index
    %c0_0 = arith.constant 0 : index
    %0 = vector.load %arg0[%c0, %c0_0] : memref<16x32xf32, #tpu.memory_space<vmem>>, vector<16x32xf32>
    %c0_1 = arith.constant 0 : index
    %c0_2 = arith.constant 0 : index
    %1 = vector.load %arg1[%c0_1, %c0_2] : memref<16x16xf32, #tpu.memory_space<vmem>>, vector<16x16xf32>
    %c0_3 = arith.constant 0 : index
    %c0_4 = arith.constant 0 : index
    %2 = vector.load %arg2[%c0_3, %c0_4] : memref<8x128xf32, #tpu.memory_space<vmem>>, vector<1x32xf32>
    %c1 = arith.constant 1 : index
    %c0_5 = arith.constant 0 : index
    %3 = vector.load %arg2[%c1, %c0_5] : memref<8x128xf32, #tpu.memory_space<vmem>>, vector<1x32xf32>
    %c2 = arith.constant 2 : index
    %c0_6 = arith.constant 0 : index
    %4 = vector.load %arg2[%c2, %c0_6] : memref<8x128xf32, #tpu.memory_space<vmem>>, vector<1x32xf32>
    %c3 = arith.constant 3 : index
    %c0_7 = arith.constant 0 : index
    %5 = vector.load %arg2[%c3, %c0_7] : memref<8x128xf32, #tpu.memory_space<vmem>>, vector<1x32xf32>
    %c4 = arith.constant 4 : index
    %c0_8 = arith.constant 0 : index
    %6 = vector.load %arg2[%c4, %c0_8] : memref<8x128xf32, #tpu.memory_space<vmem>>, vector<1x32xf32>
    %c5 = arith.constant 5 : index
    %c0_9 = arith.constant 0 : index
    %7 = vector.load %arg2[%c5, %c0_9] : memref<8x128xf32, #tpu.memory_space<vmem>>, vector<1x32xf32>
    %c6 = arith.constant 6 : index
    %c0_10 = arith.constant 0 : index
    %8 = vector.load %arg2[%c6, %c0_10] : memref<8x128xf32, #tpu.memory_space<vmem>>, vector<1x96xf32>
    %c7 = arith.constant 7 : index
    %c0_11 = arith.constant 0 : index
    %9 = vector.load %arg2[%c7, %c0_11] : memref<8x128xf32, #tpu.memory_space<vmem>>, vector<1x64xf32>
    %cst = arith.constant dense<0.000000e+00> : vector<16xf32>
    %10 = vector.multi_reduction <add>, %0, %cst [1] : vector<16x32xf32> to vector<16xf32>
    %11 = vector.shape_cast %10 : vector<16xf32> to vector<16x1xf32>
    %cst_12 = arith.constant 3.200000e+01 : f32
    %12 = vector.broadcast %cst_12 : f32 to vector<16x1xf32>
    %13 = arith.divf %11, %12 : vector<16x1xf32>
    %14 = vector.broadcast %13 : vector<16x1xf32> to vector<16x32xf32>
    %15 = arith.subf %0, %14 : vector<16x32xf32>
    %16 = arith.mulf %15, %15 : vector<16x32xf32>
    %cst_13 = arith.constant dense<0.000000e+00> : vector<16xf32>
    %17 = vector.multi_reduction <add>, %16, %cst_13 [1] : vector<16x32xf32> to vector<16xf32>
    %18 = vector.shape_cast %17 : vector<16xf32> to vector<16x1xf32>
    %cst_14 = arith.constant 3.200000e+01 : f32
    %19 = vector.broadcast %cst_14 : f32 to vector<16x1xf32>
    %20 = arith.divf %18, %19 : vector<16x1xf32>
    %21 = vector.broadcast %13 : vector<16x1xf32> to vector<16x32xf32>
    %22 = arith.subf %0, %21 : vector<16x32xf32>
    %cst_15 = arith.constant 9.99999974E-6 : f32
    %23 = vector.broadcast %cst_15 : f32 to vector<16x1xf32>
    %24 = arith.addf %20, %23 : vector<16x1xf32>
    %25 = math.rsqrt %24 : vector<16x1xf32>
    %26 = vector.broadcast %25 : vector<16x1xf32> to vector<16x32xf32>
    %27 = arith.mulf %22, %26 : vector<16x32xf32>
    %28 = vector.broadcast %2 : vector<1x32xf32> to vector<16x32xf32>
    %29 = arith.mulf %27, %28 : vector<16x32xf32>
    %30 = vector.broadcast %3 : vector<1x32xf32> to vector<16x32xf32>
    %31 = arith.addf %29, %30 : vector<16x32xf32>
    %c0_16 = arith.constant 0 : index
    %c0_17 = arith.constant 0 : index
    %32 = vector.load %arg3[%c0_16, %c0_17] : memref<32x96xf32, #tpu.memory_space<vmem>>, vector<32x96xf32>
    %cst_18 = arith.constant dense<0.000000e+00> : vector<16x96xf32>
    %33 = tpu.matmul %31, %32, %cst_18 {dimension_numbers = #tpu.dot_dimension_numbers<[1], [0], [0], [1], [0, 0, 1, 1], [], []>} : vector<16x32xf32>, vector<32x96xf32>, vector<16x96xf32> -> vector<16x96xf32>
    %34 = vector.broadcast %8 : vector<1x96xf32> to vector<16x96xf32>
    %35 = arith.addf %33, %34 : vector<16x96xf32>
    %36 = vector.extract_strided_slice %35 {offsets = [0, 0], sizes = [16, 8], strides = [1, 1]} : vector<16x96xf32> to vector<16x8xf32>
    %37 = vector.extract_strided_slice %35 {offsets = [0, 32], sizes = [16, 8], strides = [1, 1]} : vector<16x96xf32> to vector<16x8xf32>
    %38 = vector.extract_strided_slice %35 {offsets = [0, 64], sizes = [16, 8], strides = [1, 1]} : vector<16x96xf32> to vector<16x8xf32>
    %cst_19 = arith.constant dense<0.000000e+00> : vector<16x16xf32>
    %39 = tpu.matmul %36, %37, %cst_19 {dimension_numbers = #tpu.dot_dimension_numbers<[1], [1], [0], [0], [0, 0, 1, 0], [], []>} : vector<16x8xf32>, vector<16x8xf32>, vector<16x16xf32> -> vector<16x16xf32>
    %40 = arith.addf %39, %1 : vector<16x16xf32>
    %cst_20 = arith.constant dense<0xFF800000> : vector<16xf32>
    %41 = vector.multi_reduction <maximumf>, %40, %cst_20 [1] : vector<16x16xf32> to vector<16xf32>
    %42 = vector.shape_cast %41 : vector<16xf32> to vector<16x1xf32>
    %43 = vector.broadcast %42 : vector<16x1xf32> to vector<16x16xf32>
    %44 = arith.subf %40, %43 : vector<16x16xf32>
    %45 = math.exp %44 : vector<16x16xf32>
    %cst_21 = arith.constant dense<0.000000e+00> : vector<16xf32>
    %46 = vector.multi_reduction <add>, %45, %cst_21 [1] : vector<16x16xf32> to vector<16xf32>
    %47 = vector.shape_cast %46 : vector<16xf32> to vector<16x1xf32>
    %48 = tpu.reciprocal %47 : vector<16x1xf32> -> vector<16x1xf32>
    %49 = vector.broadcast %48 : vector<16x1xf32> to vector<16x16xf32>
    %50 = arith.mulf %45, %49 : vector<16x16xf32>
    %cst_22 = arith.constant dense<0.000000e+00> : vector<16x8xf32>
    %51 = tpu.matmul %50, %38, %cst_22 {dimension_numbers = #tpu.dot_dimension_numbers<[1], [0], [0], [1], [0, 0, 1, 1], [], []>} : vector<16x16xf32>, vector<16x8xf32>, vector<16x8xf32> -> vector<16x8xf32>
    %c0_23 = arith.constant 0 : index
    %c0_24 = arith.constant 0 : index
    %52 = vector.load %arg4[%c0_23, %c0_24] : memref<32x32xf32, #tpu.memory_space<vmem>>, vector<8x32xf32>
    %cst_25 = arith.constant dense<0.000000e+00> : vector<16x32xf32>
    %53 = tpu.matmul %51, %52, %cst_25 {dimension_numbers = #tpu.dot_dimension_numbers<[1], [0], [0], [1], [0, 0, 1, 1], [], []>} : vector<16x8xf32>, vector<8x32xf32>, vector<16x32xf32> -> vector<16x32xf32>
    %54 = vector.extract_strided_slice %35 {offsets = [0, 8], sizes = [16, 8], strides = [1, 1]} : vector<16x96xf32> to vector<16x8xf32>
    %55 = vector.extract_strided_slice %35 {offsets = [0, 40], sizes = [16, 8], strides = [1, 1]} : vector<16x96xf32> to vector<16x8xf32>
    %56 = vector.extract_strided_slice %35 {offsets = [0, 72], sizes = [16, 8], strides = [1, 1]} : vector<16x96xf32> to vector<16x8xf32>
    %cst_26 = arith.constant dense<0.000000e+00> : vector<16x16xf32>
    %57 = tpu.matmul %54, %55, %cst_26 {dimension_numbers = #tpu.dot_dimension_numbers<[1], [1], [0], [0], [0, 0, 1, 0], [], []>} : vector<16x8xf32>, vector<16x8xf32>, vector<16x16xf32> -> vector<16x16xf32>
    %58 = arith.addf %57, %1 : vector<16x16xf32>
    %cst_27 = arith.constant dense<0xFF800000> : vector<16xf32>
    %59 = vector.multi_reduction <maximumf>, %58, %cst_27 [1] : vector<16x16xf32> to vector<16xf32>
    %60 = vector.shape_cast %59 : vector<16xf32> to vector<16x1xf32>
    %61 = vector.broadcast %60 : vector<16x1xf32> to vector<16x16xf32>
    %62 = arith.subf %58, %61 : vector<16x16xf32>
    %63 = math.exp %62 : vector<16x16xf32>
    %cst_28 = arith.constant dense<0.000000e+00> : vector<16xf32>
    %64 = vector.multi_reduction <add>, %63, %cst_28 [1] : vector<16x16xf32> to vector<16xf32>
    %65 = vector.shape_cast %64 : vector<16xf32> to vector<16x1xf32>
    %66 = tpu.reciprocal %65 : vector<16x1xf32> -> vector<16x1xf32>
    %67 = vector.broadcast %66 : vector<16x1xf32> to vector<16x16xf32>
    %68 = arith.mulf %63, %67 : vector<16x16xf32>
    %cst_29 = arith.constant dense<0.000000e+00> : vector<16x8xf32>
    %69 = tpu.matmul %68, %56, %cst_29 {dimension_numbers = #tpu.dot_dimension_numbers<[1], [0], [0], [1], [0, 0, 1, 1], [], []>} : vector<16x16xf32>, vector<16x8xf32>, vector<16x8xf32> -> vector<16x8xf32>
    %c8 = arith.constant 8 : index
    %c0_30 = arith.constant 0 : index
    %70 = vector.load %arg4[%c8, %c0_30] : memref<32x32xf32, #tpu.memory_space<vmem>>, vector<8x32xf32>
    %cst_31 = arith.constant dense<0.000000e+00> : vector<16x32xf32>
    %71 = tpu.matmul %69, %70, %cst_31 {dimension_numbers = #tpu.dot_dimension_numbers<[1], [0], [0], [1], [0, 0, 1, 1], [], []>} : vector<16x8xf32>, vector<8x32xf32>, vector<16x32xf32> -> vector<16x32xf32>
    %72 = arith.addf %53, %71 : vector<16x32xf32>
    %73 = vector.extract_strided_slice %35 {offsets = [0, 16], sizes = [16, 8], strides = [1, 1]} : vector<16x96xf32> to vector<16x8xf32>
    %74 = vector.extract_strided_slice %35 {offsets = [0, 48], sizes = [16, 8], strides = [1, 1]} : vector<16x96xf32> to vector<16x8xf32>
    %75 = vector.extract_strided_slice %35 {offsets = [0, 80], sizes = [16, 8], strides = [1, 1]} : vector<16x96xf32> to vector<16x8xf32>
    %cst_32 = arith.constant dense<0.000000e+00> : vector<16x16xf32>
    %76 = tpu.matmul %73, %74, %cst_32 {dimension_numbers = #tpu.dot_dimension_numbers<[1], [1], [0], [0], [0, 0, 1, 0], [], []>} : vector<16x8xf32>, vector<16x8xf32>, vector<16x16xf32> -> vector<16x16xf32>
    %77 = arith.addf %76, %1 : vector<16x16xf32>
    %cst_33 = arith.constant dense<0xFF800000> : vector<16xf32>
    %78 = vector.multi_reduction <maximumf>, %77, %cst_33 [1] : vector<16x16xf32> to vector<16xf32>
    %79 = vector.shape_cast %78 : vector<16xf32> to vector<16x1xf32>
    %80 = vector.broadcast %79 : vector<16x1xf32> to vector<16x16xf32>
    %81 = arith.subf %77, %80 : vector<16x16xf32>
    %82 = math.exp %81 : vector<16x16xf32>
    %cst_34 = arith.constant dense<0.000000e+00> : vector<16xf32>
    %83 = vector.multi_reduction <add>, %82, %cst_34 [1] : vector<16x16xf32> to vector<16xf32>
    %84 = vector.shape_cast %83 : vector<16xf32> to vector<16x1xf32>
    %85 = tpu.reciprocal %84 : vector<16x1xf32> -> vector<16x1xf32>
    %86 = vector.broadcast %85 : vector<16x1xf32> to vector<16x16xf32>
    %87 = arith.mulf %82, %86 : vector<16x16xf32>
    %cst_35 = arith.constant dense<0.000000e+00> : vector<16x8xf32>
    %88 = tpu.matmul %87, %75, %cst_35 {dimension_numbers = #tpu.dot_dimension_numbers<[1], [0], [0], [1], [0, 0, 1, 1], [], []>} : vector<16x16xf32>, vector<16x8xf32>, vector<16x8xf32> -> vector<16x8xf32>
    %c16 = arith.constant 16 : index
    %c0_36 = arith.constant 0 : index
    %89 = vector.load %arg4[%c16, %c0_36] : memref<32x32xf32, #tpu.memory_space<vmem>>, vector<8x32xf32>
    %cst_37 = arith.constant dense<0.000000e+00> : vector<16x32xf32>
    %90 = tpu.matmul %88, %89, %cst_37 {dimension_numbers = #tpu.dot_dimension_numbers<[1], [0], [0], [1], [0, 0, 1, 1], [], []>} : vector<16x8xf32>, vector<8x32xf32>, vector<16x32xf32> -> vector<16x32xf32>
    %91 = arith.addf %72, %90 : vector<16x32xf32>
    %92 = vector.extract_strided_slice %35 {offsets = [0, 24], sizes = [16, 8], strides = [1, 1]} : vector<16x96xf32> to vector<16x8xf32>
    %93 = vector.extract_strided_slice %35 {offsets = [0, 56], sizes = [16, 8], strides = [1, 1]} : vector<16x96xf32> to vector<16x8xf32>
    %94 = vector.extract_strided_slice %35 {offsets = [0, 88], sizes = [16, 8], strides = [1, 1]} : vector<16x96xf32> to vector<16x8xf32>
    %cst_38 = arith.constant dense<0.000000e+00> : vector<16x16xf32>
    %95 = tpu.matmul %92, %93, %cst_38 {dimension_numbers = #tpu.dot_dimension_numbers<[1], [1], [0], [0], [0, 0, 1, 0], [], []>} : vector<16x8xf32>, vector<16x8xf32>, vector<16x16xf32> -> vector<16x16xf32>
    %96 = arith.addf %95, %1 : vector<16x16xf32>
    %cst_39 = arith.constant dense<0xFF800000> : vector<16xf32>
    %97 = vector.multi_reduction <maximumf>, %96, %cst_39 [1] : vector<16x16xf32> to vector<16xf32>
    %98 = vector.shape_cast %97 : vector<16xf32> to vector<16x1xf32>
    %99 = vector.broadcast %98 : vector<16x1xf32> to vector<16x16xf32>
    %100 = arith.subf %96, %99 : vector<16x16xf32>
    %101 = math.exp %100 : vector<16x16xf32>
    %cst_40 = arith.constant dense<0.000000e+00> : vector<16xf32>
    %102 = vector.multi_reduction <add>, %101, %cst_40 [1] : vector<16x16xf32> to vector<16xf32>
    %103 = vector.shape_cast %102 : vector<16xf32> to vector<16x1xf32>
    %104 = tpu.reciprocal %103 : vector<16x1xf32> -> vector<16x1xf32>
    %105 = vector.broadcast %104 : vector<16x1xf32> to vector<16x16xf32>
    %106 = arith.mulf %101, %105 : vector<16x16xf32>
    %cst_41 = arith.constant dense<0.000000e+00> : vector<16x8xf32>
    %107 = tpu.matmul %106, %94, %cst_41 {dimension_numbers = #tpu.dot_dimension_numbers<[1], [0], [0], [1], [0, 0, 1, 1], [], []>} : vector<16x16xf32>, vector<16x8xf32>, vector<16x8xf32> -> vector<16x8xf32>
    %c24 = arith.constant 24 : index
    %c0_42 = arith.constant 0 : index
    %108 = vector.load %arg4[%c24, %c0_42] : memref<32x32xf32, #tpu.memory_space<vmem>>, vector<8x32xf32>
    %cst_43 = arith.constant dense<0.000000e+00> : vector<16x32xf32>
    %109 = tpu.matmul %107, %108, %cst_43 {dimension_numbers = #tpu.dot_dimension_numbers<[1], [0], [0], [1], [0, 0, 1, 1], [], []>} : vector<16x8xf32>, vector<8x32xf32>, vector<16x32xf32> -> vector<16x32xf32>
    %110 = arith.addf %91, %109 : vector<16x32xf32>
    %111 = arith.addf %0, %110 : vector<16x32xf32>
    %112 = vector.broadcast %6 : vector<1x32xf32> to vector<16x32xf32>
    %113 = arith.addf %111, %112 : vector<16x32xf32>
    %cst_44 = arith.constant dense<0.000000e+00> : vector<16xf32>
    %114 = vector.multi_reduction <add>, %113, %cst_44 [1] : vector<16x32xf32> to vector<16xf32>
    %115 = vector.shape_cast %114 : vector<16xf32> to vector<16x1xf32>
    %cst_45 = arith.constant 3.200000e+01 : f32
    %116 = vector.broadcast %cst_45 : f32 to vector<16x1xf32>
    %117 = arith.divf %115, %116 : vector<16x1xf32>
    %118 = vector.broadcast %117 : vector<16x1xf32> to vector<16x32xf32>
    %119 = arith.subf %113, %118 : vector<16x32xf32>
    %120 = arith.mulf %119, %119 : vector<16x32xf32>
    %cst_46 = arith.constant dense<0.000000e+00> : vector<16xf32>
    %121 = vector.multi_reduction <add>, %120, %cst_46 [1] : vector<16x32xf32> to vector<16xf32>
    %122 = vector.shape_cast %121 : vector<16xf32> to vector<16x1xf32>
    %cst_47 = arith.constant 3.200000e+01 : f32
    %123 = vector.broadcast %cst_47 : f32 to vector<16x1xf32>
    %124 = arith.divf %122, %123 : vector<16x1xf32>
    %125 = vector.broadcast %117 : vector<16x1xf32> to vector<16x32xf32>
    %126 = arith.subf %113, %125 : vector<16x32xf32>
    %cst_48 = arith.constant 9.99999974E-6 : f32
    %127 = vector.broadcast %cst_48 : f32 to vector<16x1xf32>
    %128 = arith.addf %124, %127 : vector<16x1xf32>
    %129 = math.rsqrt %128 : vector<16x1xf32>
    %130 = vector.broadcast %129 : vector<16x1xf32> to vector<16x32xf32>
    %131 = arith.mulf %126, %130 : vector<16x32xf32>
    %132 = vector.broadcast %4 : vector<1x32xf32> to vector<16x32xf32>
    %133 = arith.mulf %131, %132 : vector<16x32xf32>
    %134 = vector.broadcast %5 : vector<1x32xf32> to vector<16x32xf32>
    %135 = arith.addf %133, %134 : vector<16x32xf32>
    %c0_49 = arith.constant 0 : index
    %c0_50 = arith.constant 0 : index
    %136 = vector.load %arg5[%c0_49, %c0_50] : memref<32x64xf32, #tpu.memory_space<vmem>>, vector<32x64xf32>
    %cst_51 = arith.constant dense<0.000000e+00> : vector<16x64xf32>
    %137 = tpu.matmul %135, %136, %cst_51 {dimension_numbers = #tpu.dot_dimension_numbers<[1], [0], [0], [1], [0, 0, 1, 1], [], []>} : vector<16x32xf32>, vector<32x64xf32>, vector<16x64xf32> -> vector<16x64xf32>
    %138 = vector.broadcast %9 : vector<1x64xf32> to vector<16x64xf32>
    %139 = arith.addf %137, %138 : vector<16x64xf32>
    %cst_52 = arith.constant 5.000000e-01 : f32
    %140 = vector.broadcast %cst_52 : f32 to vector<16x64xf32>
    %141 = arith.mulf %140, %139 : vector<16x64xf32>
    %cst_53 = arith.constant 1.41421354 : f32
    %142 = vector.broadcast %cst_53 : f32 to vector<16x64xf32>
    %143 = arith.divf %139, %142 : vector<16x64xf32>
    %144 = math.erf %143 : vector<16x64xf32>
    %cst_54 = arith.constant 1.000000e+00 : f32
    %145 = vector.broadcast %cst_54 : f32 to vector<16x64xf32>
    %146 = arith.addf %145, %144 : vector<16x64xf32>
    %147 = arith.mulf %141, %146 : vector<16x64xf32>
    %c0_55 = arith.constant 0 : index
    %c0_56 = arith.constant 0 : index
    %148 = vector.load %arg6[%c0_55, %c0_56] : memref<64x32xf32, #tpu.memory_space<vmem>>, vector<64x32xf32>
    %cst_57 = arith.constant dense<0.000000e+00> : vector<16x32xf32>
    %149 = tpu.matmul %147, %148, %cst_57 {dimension_numbers = #tpu.dot_dimension_numbers<[1], [0], [0], [1], [0, 0, 1, 1], [], []>} : vector<16x64xf32>, vector<64x32xf32>, vector<16x32xf32> -> vector<16x32xf32>
    %150 = vector.broadcast %7 : vector<1x32xf32> to vector<16x32xf32>
    %151 = arith.addf %149, %150 : vector<16x32xf32>
    %152 = arith.addf %113, %151 : vector<16x32xf32>
    %c0_58 = arith.constant 0 : index
    %c0_59 = arith.constant 0 : index
    %153 = vector.load %arg7[%c0_58, %c0_59] : memref<16x32xf32, #tpu.memory_space<vmem>>, vector<16x32xf32>
    tpu.vector_store %arg7[%c0_58, %c0_59], %152 {strides = array<i32>} : memref<16x32xf32, #tpu.memory_space<vmem>>, vector<16x32xf32>,
    return
  }
}

</mosaic_0001>

<bundles_post_ra>
// kernel: tpu_custom_call.1
= control target key start
LH: loop header
LB: loop body
LE: loop exit
PB: predicated region body
PF: predicated region fallthrough
CT: control target
= control target key end

     0   :  { %12 = vsyncpa [#allocation3], 0  ;;  %s2251_s0 = inlined_call_operand.hbm [shape: f32[16,32], index: 0, kind: input, shape index: {}]   ;;  %s2252_s1 = inlined_call_operand.hbm [shape: f32[16,16], index: 1, kind: input, shape index: {}]   ;;  %s2253_s2 = inlined_call_operand.hbm [shape: f32[8,128], index: 2, kind: input, shape index: {}]   ;;  %s2254_s3 = inlined_call_operand.vmem [shape: f32[32,96], index: 3, kind: input, shape index: {}]   ;;  %s2255_s4 = inlined_call_operand.vmem [shape: f32[32,32], index: 4, kind: input, shape index: {}]   ;;  %s2256_s5 = inlined_call_operand.vmem [shape: f32[32,64], index: 5, kind: input, shape index: {}]   ;;  %s2257_s6 = inlined_call_operand.vmem [shape: f32[64,32], index: 6, kind: input, shape index: {}]   ;;  %s2258_s7 = inlined_call_operand.hbm [shape: f32[16,32], index: 7, kind: output, shape index: {}]  }
   0x1   :  { %13 = vsyncpa [#allocation6], 0 }
   0x2   :  { %14 = vsyncpa [#allocation4], 0  ;;  %s1977_s24 = smov [#allocation5]   ;;  %s1978_s26 = smov [#allocation2]  }
   0x3   :  { %s32_s25 = sshll.u32 %s1977_s24, 4  ;;  %s20_s27 = sshll.u32 %s1978_s26, 4  ;;  %s33_s25 = int_to_ptr.vmem [resolvable:$true] %s32_s25  ;;  %s21_s27 = int_to_ptr.vmem [resolvable:$true] %s20_s27 }
   0x4   :  { %s1899_s28 = scalar_lea.vmem %s33_s25, 256  ;;  %p1904_p1 = scmp.lt.s32.totalorder %s33_s25, %s33_s25 }
   0x5   :  { %p1900_p0 = scmp.ne.s32.totalorder %s33_s25, %s1899_s28  ;;  %p1905_p2 = scmp.lt.s32.totalorder %s1899_s28, %s1899_s28 }
   0x7   :  { %p1906_p3 = por %p1905_p2, %p1904_p1 }
   0x9   :  { %p1907_p4 = pnand %p1906_p3, %p1900_p0 }
   0xb   :  { %1910 = shalt.err (!%p1907_p4)
}
   0xc   :  { %s1979_s29 = smov 128   ;;  %s1980_s30 = smov 8  }
   0xd   :  { %38 = dma.hbm_to_vmem [thread:$0]  %s2252_s1, 256, %s33_s25, [#allocation6], %s1979_s29, %s1979_s29, %s1980_s30  }
   0xe   :  { %s1919_s10 = scalar_lea.vmem %s21_s27, 256  ;;  %p1924_p6 = scmp.lt.s32.totalorder %s21_s27, %s21_s27 }
   0xf   :  { %p1920_p5 = scmp.ne.s32.totalorder %s21_s27, %s1919_s10  ;;  %p1925_p7 = scmp.lt.s32.totalorder %s1919_s10, %s1919_s10 }
  0x11   :  { %p1926_p8 = por %p1925_p7, %p1924_p6 }
  0x13   :  { %p1927_p9 = pnand %p1926_p8, %p1920_p5 }
  0x15   :  { %1930 = shalt.err (!%p1927_p9)
}
  0x16   :  { %26 = dma.hbm_to_vmem [thread:$0]  %s2251_s0, 256, %s21_s27, [#allocation3], %s1979_s29, %s1979_s29, %s1980_s30  }
  0x17   :  { %s1981_s13 = smov [#allocation7]  }
  0x18   :  { %s45_s14 = sshll.u32 %s1981_s13, 4  ;;  %s46_s14 = int_to_ptr.vmem [resolvable:$true] %s45_s14 }
  0x19   :  { %s1939_s15 = scalar_lea.vmem %s46_s14, 128  ;;  %p1944_p11 = scmp.lt.s32.totalorder %s46_s14, %s46_s14 }
  0x1a   :  { %p1940_p10 = scmp.ne.s32.totalorder %s46_s14, %s1939_s15  ;;  %p1945_p12 = scmp.lt.s32.totalorder %s1939_s15, %s1939_s15 }
  0x1c   :  { %p1946_p13 = por %p1945_p12, %p1944_p11 }
  0x1e   :  { %p1947_p0 = pnand %p1946_p13, %p1940_p10 }
  0x20   :  { %1950 = shalt.err (!%p1947_p0)
}
  0x21   :  { %48 = dma.hbm_to_vmem [thread:$0]  %s2253_s2, 128, %s46_s14, [#allocation6]  }
  0x22   :  { %1971 = dma.done.wait [#allocation3], 256  }
  0x23   :  { %1972 = vsyncadd [#allocation3], 4294967040 }
  0x24   :  { %1973 = dma.done.wait [#allocation6], 384  }
  0x25   :  { %1974 = vsyncadd [#allocation6], 4294966912  ;;  %vm78_vm0 = vcmask 261120   ;;  %v2049_v0 = vld [vmem:[#allocation2] sm:$0xff]  ;;  %v2051_v1 = vld [vmem:[#allocation2 + $0x8] sm:$0xff]  ;;  %vm213_vm1 = vcmask 64512  }
  0x26   :  { %v79_v2 = vsel %vm78_vm0, %v2049_v0, 0.0  ;;  %v82_v3 = vsel %vm78_vm0, %v2051_v1, 0.0  ;;  %v121_v14 = vld [vmem:[%s2254_s3 + $0x18] sm:$0xff]  ;;  %v120_v15 = vld [vmem:[%s2254_s3 + $0x10] sm:$0xff]  ;;  %v119_v16 = vld [vmem:[%s2254_s3 + $0x8] sm:$0xff]  ;;  %s1983_s23 = smov 120  }
  0x27   :  { %80 = vadd.xlane.f32.xlu0 %v79_v2  ;;  %1713 = vmatprep.subr.mxu0 %v121_v14  ;;  %v118_v17 = vld [vmem:[%s2254_s3] sm:$0xff]  ;;  %s1982_s3 = smov 96   ;;  %s1984_s24 = smov 88   ;;  %v2099_v45 = vld [vmem:[#allocation5 + $0x8] sm:$0xff]  ;;  %v2101_v47 = vld [vmem:[#allocation5] sm:$0xff]  ;;  %vm297_vm2 = vcmask 130048  }
  0x28   :  { %1714 = vmatpush3.msra.mxu0 %v121_v14  ;;  %v1601_v25 = vld [vmem:[#allocation7] ss:$0 sm:$0xff]  ;;  %v1602_v27 = vld [vmem:[#allocation7 + $0x1] ss:$0 sm:$0xff]  ;;  %v1603_v34 = vld [vmem:[#allocation7 + $0x6] ss:$0 sm:$0xff] }
  0x29   :  { %1715 = vmatprep.subr.mxu0 %v120_v15  ;;  %s1985_s25 = smov 64   ;;  %s1986_s26 = smov 56   ;;  %vm1497_vm3 = vcmask 523264  }
  0x2a   :  { %1716 = vmatpush3.msra.mxu0 %v120_v15  ;;  %s1987_s27 = smov 80   ;;  %s1988_s28 = smov 112  }
  0x2b   :  { %83 = vadd.xlane.f32.xlu0 %v82_v3  ;;  %1717 = vmatprep.subr.mxu0 %v119_v16  ;;  %s1989_s8 = smov 72   ;;  %s1990_s9 = smov 104  }
  0x2c   :  { %1718 = vmatpush3.msra.mxu0 %v119_v16  ;;  %s1991_s14 = smov 48   ;;  %s1992_s15 = smov 40  }
  0x2d   :  { %1719 = vmatprep.subr.mxu0 %v118_v17 }
  0x2e   :  { %1720 = vmatpush3.msra.mxu0 %v118_v17 }
  0xb0   :  { %v81_v4 = vpop.xlane.xlu0 %80 }
  0xb1   :  { %v86_v5 = vmul.f32 0.03125, %v81_v4 }
  0xb3   :  { %v88_v6 = vsub.f32 %v2049_v0, %v86_v5 }
  0xb4   :  { %v84_v7 = vpop.xlane.xlu0 %83 }
  0xb5   :  { %v87_v8 = vmul.f32 0.03125, %v84_v7  ;;  %v90_v9 = vmul.f32 %v88_v6, %v88_v6 }
  0xb7   :  { %v89_v10 = vsub.f32 %v2051_v1, %v87_v8  ;;  %v92_v11 = vsel %vm78_vm0, %v90_v9, 0.0 }
  0xb8   :  { %93 = vadd.xlane.f32.xlu1 %v92_v11 }
  0xb9   :  { %v91_v12 = vmul.f32 %v89_v10, %v89_v10 }
  0xbb   :  { %v95_v13 = vsel %vm78_vm0, %v91_v12, 0.0 }
  0xbc   :  { %96 = vadd.xlane.f32.xlu1 %v95_v13 }
 0x141   :  { %v94_v18 = vpop.xlane.xlu1 %93 }
 0x142   :  { %v98_v19 = vmul.f32 0.03125, %v94_v18 }
 0x144   :  { %v100_v20 = vadd.f32 1e-05, %v98_v19 }
 0x145   :  { %v97_v21 = vpop.xlane.xlu1 %96 }
 0x146   :  { %1847 = vrsqrt.f32 %v100_v20  ;;  %v99_v22 = vmul.f32 0.03125, %v97_v21 }
 0x148   :  { %v101_v23 = vadd.f32 1e-05, %v99_v22 }
 0x14a   :  { %1849 = vrsqrt.f32 %v101_v23 }
 0x153   :  { %v1848_v24 = vpop.eup %1847 }
 0x154   :  { %v104_v26 = vmul.f32 %v1848_v24, %v88_v6 }
 0x156   :  { %v110_v28 = vmul.f32 %v1601_v25, %v104_v26 }
 0x157   :  { %v1850_v29 = vpop.eup %1849 }
 0x158   :  { %v105_v30 = vmul.f32 %v1850_v29, %v89_v10  ;;  %v116_v31 = vadd.f32 %v1602_v27, %v110_v28 }
 0x15a   :  { %v111_v32 = vmul.f32 %v1601_v25, %v105_v30  ;;  %1721 = vmatprep.mubr.msk.f32.mxu0 %vm78_vm0, %v116_v31 }
 0x15c   :  { %v117_v33 = vadd.f32 %v1602_v27, %v111_v32 }
 0x15e   :  { %1722 = vmatmul.mubr.msk.f32.vlgmr.msra.gmra.mxu0 %vm78_vm0, %v117_v33  ;;  %v608_v33 = vld [vmem:[%s2255_s4 + $0x8] sm:$0xff] }
 0x21e   :  { %v1723_v35 = vpop.f32.mrf.mxu0 }
 0x21f   :  { %v2075_v36 = vadd.f32 %v1723_v35, %v1603_v34 }
 0x220   :  { %v198_v37 = vpop.f32.mrf.mxu0 }
 0x221   :  { %v2077_v38 = vadd.f32 %v1603_v34, %v198_v37  ;;  %211 = vrot.lane.b32.xlu0 %v2075_v36, %s1982_s3  ;;  %v407_v34 = vld [vmem:[%s2255_s4] sm:$0xff] }
 0x223   :  { %209 = vrot.lane.b32.xlu1 %v2077_v38, %s1982_s3  ;;  %1728 = vmatprep.mubr.msk.f32.mxu1 %vm213_vm1, %v2077_v38 }
 0x225   :  { %408 = vrot.lane.b32.xlu0 %v2077_v38, %s1983_s23 }
 0x227   :  { %414 = vrot.lane.b32.xlu1 %v2075_v36, %s1984_s24 }
 0x22b   :  { %412 = vrot.lane.b32.xlu1 %v2077_v38, %s1984_s24 }
 0x22f   :  { %410 = vrot.lane.b32.xlu1 %v2075_v36, %s1983_s23 }
 0x293   :  { %v212_v39 = vpop.permute.xlu0 %211 }
 0x294   :  { %1724 = vmatprep.subr.msk.mxu1 %vm213_vm1, %v212_v39 }
 0x295   :  { %1725 = vmatpush3.xpose.msk.msra.mxu1 %vm213_vm1, %v212_v39  ;;  %v210_v40 = vpop.permute.xlu1 %209 }
 0x296   :  { %1726 = vmatprep.subr.msk.mxu1 %vm213_vm1, %v210_v40 }
 0x297   :  { %v409_v42 = vpop.permute.xlu0 %408 }
 0x299   :  { %1727 = vmatpush3.xpose.msk.msra.mxu1 %vm213_vm1, %v210_v40  ;;  %v415_v41 = vpop.permute.xlu1 %414 }
 0x29a   :  { %1738 = vmatprep.subr.msk.mxu1 %vm213_vm1, %v415_v41 }
 0x29c   :  { %1729 = vmatmul.mubr.msk.f32.vlgmr.msra.gmra.mxu1 %vm213_vm1, %v2075_v36 }
 0x29d   :  { %v413_v43 = vpop.permute.xlu1 %412  ;;  %1739 = vmatpush3.xpose.msk.msra.mxu1 %vm213_vm1, %v415_v41  ;;  %1742 = vmatprep.mubr.msk.f32.mxu1 %vm213_vm1, %v409_v42 }
 0x29e   :  { %1740 = vmatprep.subr.msk.mxu1 %vm213_vm1, %v413_v43 }
 0x2a1   :  { %1741 = vmatpush3.xpose.msk.msra.mxu1 %vm213_vm1, %v413_v43  ;;  %v411_v44 = vpop.permute.xlu1 %410 }
 0x2a4   :  { %1743 = vmatmul.mubr.msk.f32.vlgmr.msra.gmra.mxu1 %vm213_vm1, %v411_v44 }
 0x35c   :  { %v1730_v46 = vpop.f32.mrf.mxu1 }
 0x35d   :  { %v294_v48 = vadd.f32 %v1730_v46, %v2099_v45 }
 0x35e   :  { %v288_v49 = vpop.f32.mrf.mxu1 }
 0x35f   :  { %v289_v50 = vadd.f32 %v288_v49, %v2101_v47  ;;  %v301_v51 = vsel %vm297_vm2, %v294_v48, -inf }
 0x360   :  { %302 = vmax.xlane.f32.xlu1 %v301_v51 }
 0x361   :  { %v298_v52 = vsel %vm297_vm2, %v289_v50, -inf }
 0x362   :  { %299 = vmax.xlane.f32.xlu0 %v298_v52 }
 0x364   :  { %v1744_v53 = vpop.f32.mrf.mxu1 }
 0x365   :  { %v496_v56 = vadd.f32 %v1744_v53, %v2099_v45 }
 0x366   :  { %v490_v54 = vpop.f32.mrf.mxu1 }
 0x367   :  { %v491_v55 = vadd.f32 %v490_v54, %v2101_v47  ;;  %v502_v58 = vsel %vm297_vm2, %v496_v56, -inf }
 0x369   :  { %v499_v57 = vsel %vm297_vm2, %v491_v55, -inf }
 0x36a   :  { %500 = vmax.xlane.f32.xlu0 %v499_v57 }
 0x36e   :  { %503 = vmax.xlane.f32.xlu0 %v502_v58 }
 0x3e9   :  { %v303_v59 = vpop.xlane.xlu1 %302 }
 0x3ea   :  { %v305_v60 = vsub.f32 %v294_v48, %v303_v59 }
 0x3eb   :  { %v300_v61 = vpop.xlane.xlu0 %299 }
 0x3ec   :  { %v308_v62 = vmul.f32 1.442695, %v305_v60  ;;  %v304_v63 = vsub.f32 %v289_v50, %v300_v61 }
 0x3ee   :  { %1851 = vpow2.f32 %v308_v62  ;;  %v306_v2 = vmul.f32 1.442695, %v304_v63 }
 0x3f0   :  { %1853 = vpow2.f32 %v306_v2 }
 0x3f3   :  { %v501_v3 = vpop.xlane.xlu0 %500 }
 0x3f4   :  { %v505_v4 = vsub.f32 %v491_v55, %v501_v3 }
 0x3f6   :  { %v507_v5 = vmul.f32 1.442695, %v505_v4 }
 0x3f7   :  { %v504_v6 = vpop.xlane.xlu0 %503 }
 0x3f8   :  { %1855 = vpow2.f32 %v507_v5  ;;  %v506_v7 = vsub.f32 %v496_v56, %v504_v6 }
 0x3fa   :  { %v509_v8 = vmul.f32 1.442695, %v506_v7 }
 0x3fb   :  { %v1852_v9 = vpop.eup %1851 }
 0x3fc   :  { %1857 = vpow2.f32 %v509_v8  ;;  %v313_v10 = vsel %vm297_vm2, %v1852_v9, 0.0 }
 0x3fd   :  { %v1854_v11 = vpop.eup %1853  ;;  %314 = vadd.xlane.f32.xlu1 %v313_v10 }
 0x3fe   :  { %v310_v12 = vsel %vm297_vm2, %v1854_v11, 0.0 }
 0x3ff   :  { %311 = vadd.xlane.f32.xlu0 %v310_v12 }
 0x405   :  { %v1856_v13 = vpop.eup %1855 }
 0x406   :  { %v511_v14 = vsel %vm297_vm2, %v1856_v13, 0.0 }
 0x407   :  { %512 = vadd.xlane.f32.xlu0 %v511_v14 }
 0x409   :  { %v1858_v15 = vpop.eup %1857 }
 0x40a   :  { %v514_v16 = vsel %vm297_vm2, %v1858_v15, 0.0 }
 0x40b   :  { %515 = vadd.xlane.f32.xlu1 %v514_v16 }
 0x41c   :  { %320 = vrot.lane.b32.xlu1 %v2077_v38, %s1985_s25 }
 0x41d   :  { %322 = vrot.lane.b32.xlu0 %v2075_v36, %s1985_s25 }
 0x420   :  { %523 = vrot.lane.b32.xlu1 %v2075_v36, %s1986_s26 }
 0x421   :  { %777 = vrot.lane.b32.xlu0 %v2075_v36, %s1987_s27 }
 0x424   :  { %521 = vrot.lane.b32.xlu1 %v2077_v38, %s1986_s26 }
 0x425   :  { %771 = vrot.lane.b32.xlu0 %v2077_v38, %s1988_s28 }
 0x428   :  { %775 = vrot.lane.b32.xlu1 %v2077_v38, %s1987_s27 }
 0x429   :  { %1061 = vrot.lane.b32.xlu0 %v2075_v36, %s1989_s8 }
 0x42c   :  { %773 = vrot.lane.b32.xlu1 %v2075_v36, %s1988_s28 }
 0x42d   :  { %1055 = vrot.lane.b32.xlu0 %v2077_v38, %s1990_s9 }
 0x430   :  { %1059 = vrot.lane.b32.xlu1 %v2077_v38, %s1989_s8 }
 0x434   :  { %1057 = vrot.lane.b32.xlu1 %v2075_v36, %s1990_s9 }
 0x486   :  { %v315_v17 = vpop.xlane.xlu1 %314 }
 0x487   :  { %1859 = vrcp.f32 %v315_v17 }
 0x488   :  { %v312_v18 = vpop.xlane.xlu0 %311 }
 0x489   :  { %1861 = vrcp.f32 %v312_v18 }
 0x490   :  { %v513_v19 = vpop.xlane.xlu0 %512 }
 0x491   :  { %1863 = vrcp.f32 %v513_v19 }
 0x494   :  { %v516_v20 = vpop.xlane.xlu1 %515  ;;  %v323_v21 = vpop.permute.xlu0 %322 }
 0x495   :  { %v1860_v22 = vpop.eup %1859  ;;  %1865 = vrcp.f32 %v516_v20  ;;  %1731 = vmatprep.subr.mxu0 %v323_v21 }
 0x496   :  { %v1862_v23 = vpop.eup %1861  ;;  %1732 = vmatpush3.msra.mxu0 %v323_v21  ;;  %v319_v26 = vmul.f32 %v1860_v22, %v1852_v9 }
 0x497   :  { %v318_v24 = vmul.f32 %v1862_v23, %v1854_v11 }
 0x498   :  { %v321_v25 = vpop.permute.xlu1 %320  ;;  %v778_v37 = vpop.permute.xlu0 %777 }
 0x499   :  { %1733 = vmatprep.subr.mxu0 %v321_v25  ;;  %1735 = vmatprep.mubr.msk.f32.mxu0 %vm297_vm2, %v318_v24 }
 0x49a   :  { %1734 = vmatpush3.msra.mxu0 %v321_v25 }
 0x49b   :  { %1736 = vmatmul.mubr.msk.f32.vlgmr.msra.gmra.mxu0 %vm297_vm2, %v319_v26 }
 0x49c   :  { %v524_v27 = vpop.permute.xlu1 %523  ;;  %v772_v42 = vpop.permute.xlu0 %771 }
 0x49d   :  { %1745 = vmatprep.subr.mxu0 %v524_v27 }
 0x49e   :  { %v1864_v28 = vpop.eup %1863  ;;  %1746 = vmatpush3.msra.mxu0 %v524_v27 }
 0x49f   :  { %v519_v29 = vmul.f32 %v1864_v28, %v1856_v13 }
 0x4a0   :  { %v522_v30 = vpop.permute.xlu1 %521  ;;  %v1062_v44 = vpop.permute.xlu0 %1061 }
 0x4a1   :  { %1747 = vmatprep.subr.mxu0 %v522_v30  ;;  %1749 = vmatprep.mubr.msk.f32.mxu0 %vm297_vm2, %v519_v29 }
 0x4a2   :  { %v1866_v31 = vpop.eup %1865  ;;  %1748 = vmatpush3.msra.mxu0 %v522_v30 }
 0x4a3   :  { %v520_v32 = vmul.f32 %v1866_v31, %v1858_v15  ;;  %1752 = vmatprep.subr.mxu0 %v608_v33 }
 0x4a4   :  { %v776_v43 = vpop.permute.xlu1 %775  ;;  %v1056_v48 = vpop.permute.xlu0 %1055 }
 0x4a5   :  { %1750 = vmatmul.mubr.msk.f32.vlgmr.msra.gmra.mxu0 %vm297_vm2, %v520_v32 }
 0x4a6   :  { %1753 = vmatpush3.msra.mxu0 %v608_v33 }
 0x4a7   :  { %1757 = vmatprep.subr.mxu0 %v407_v34 }
 0x4a8   :  { %v774_v46 = vpop.permute.xlu1 %773 }
 0x4ac   :  { %v1060_v49 = vpop.permute.xlu1 %1059 }
 0x4b0   :  { %v1058_v50 = vpop.permute.xlu1 %1057 }
 0x55b   :  { %v1737_v35 = vpop.f32.mrf.mxu0 }
 0x55d   :  { %v398_v39 = vpop.f32.mrf.mxu0 }
 0x565   :  { %v1751_v40 = vpop.f32.mrf.mxu0 }
 0x567   :  { %v599_v41 = vpop.f32.mrf.mxu0 }
 0x568   :  { %1754 = vmatprep.mubr.msk.f32.mxu0 %vm213_vm1, %v599_v41 }
 0x569   :  { %1755 = vmatmul.mubr.msk.f32.vlgmr.msra.gmra.mxu0 %vm213_vm1, %v1751_v40 }
 0x56a   :  { %1758 = vmatpush3.msra.mxu0 %v407_v34  ;;  %1759 = vmatprep.mubr.msk.f32.mxu0 %vm213_vm1, %v398_v39 }
 0x56b   :  { %1762 = vmatprep.subr.msk.mxu0 %vm213_vm1, %v778_v37 }
 0x56d   :  { %1760 = vmatmul.mubr.msk.f32.vlgmr.msra.gmra.mxu0 %vm213_vm1, %v1737_v35 }
 0x56e   :  { %1763 = vmatpush3.xpose.msk.msra.mxu0 %vm213_vm1, %v778_v37  ;;  %1766 = vmatprep.mubr.msk.f32.mxu0 %vm213_vm1, %v772_v42 }
 0x56f   :  { %1764 = vmatprep.subr.msk.mxu0 %vm213_vm1, %v776_v43 }
 0x572   :  { %1765 = vmatpush3.xpose.msk.msra.mxu0 %vm213_vm1, %v776_v43 }
 0x573   :  { %1781 = vmatprep.subr.msk.mxu0 %vm213_vm1, %v1062_v44 }
 0x575   :  { %1767 = vmatmul.mubr.msk.f32.vlgmr.msra.gmra.mxu0 %vm213_vm1, %v774_v46 }
 0x576   :  { %1782 = vmatpush3.xpose.msk.msra.mxu0 %vm213_vm1, %v1062_v44  ;;  %1785 = vmatprep.mubr.msk.f32.mxu0 %vm213_vm1, %v1056_v48 }
 0x577   :  { %1783 = vmatprep.subr.msk.mxu0 %vm213_vm1, %v1060_v49 }
 0x57a   :  { %1784 = vmatpush3.xpose.msk.msra.mxu0 %vm213_vm1, %v1060_v49 }
 0x57d   :  { %1786 = vmatmul.mubr.msk.f32.vlgmr.msra.gmra.mxu0 %vm213_vm1, %v1058_v50 }
 0x629   :  { %v1756_v51 = vpop.f32.mrf.mxu0 }
 0x62b   :  { %v681_v52 = vpop.f32.mrf.mxu0 }
 0x62d   :  { %v1761_v53 = vpop.f32.mrf.mxu0 }
 0x62e   :  { %v2153_v54 = vadd.f32 %v1761_v53, %v1756_v51 }
 0x62f   :  { %v762_v55 = vpop.f32.mrf.mxu0 }
 0x630   :  { %v2155_v56 = vadd.f32 %v762_v55, %v681_v52 }
 0x635   :  { %v1768_v57 = vpop.f32.mrf.mxu0 }
 0x636   :  { %v859_v58 = vadd.f32 %v1768_v57, %v2099_v45  ;;  %v1638_v57 = vld [vmem:[#allocation7 + $0x4] ss:$0 sm:$0xff] }
 0x637   :  { %v853_v59 = vpop.f32.mrf.mxu0 }
 0x638   :  { %v854_v60 = vadd.f32 %v853_v59, %v2101_v47  ;;  %v865_v61 = vsel %vm297_vm2, %v859_v58, -inf }
 0x639   :  { %866 = vmax.xlane.f32.xlu1 %v865_v61 }
 0x63a   :  { %v862_v62 = vsel %vm297_vm2, %v854_v60, -inf }
 0x63b   :  { %863 = vmax.xlane.f32.xlu0 %v862_v62 }
 0x63d   :  { %v1787_v63 = vpop.f32.mrf.mxu0 }
 0x63e   :  { %v1143_v18 = vadd.f32 %v1787_v63, %v2099_v45  ;;  %v971_v45 = vld [vmem:[%s2255_s4 + $0x10] sm:$0xff] }
 0x63f   :  { %v1137_v2 = vpop.f32.mrf.mxu0 }
 0x640   :  { %v1138_v3 = vadd.f32 %v1137_v2, %v2101_v47  ;;  %v1149_v19 = vsel %vm297_vm2, %v1143_v18, -inf }
 0x642   :  { %v1146_v4 = vsel %vm297_vm2, %v1138_v3, -inf }
 0x64a   :  { %884 = vrot.lane.b32.xlu1 %v2077_v38, %s1991_s14 }
 0x66e   :  { %1147 = vmax.xlane.f32.xlu1 %v1146_v4 }
 0x6c2   :  { %v867_v5 = vpop.xlane.xlu1 %866 }
 0x6c3   :  { %v869_v6 = vsub.f32 %v859_v58, %v867_v5 }
 0x6c4   :  { %v864_v7 = vpop.xlane.xlu0 %863 }
 0x6c5   :  { %v872_v8 = vmul.f32 1.442695, %v869_v6  ;;  %v868_v9 = vsub.f32 %v854_v60, %v864_v7 }
 0x6c6   :  { %v885_v47 = vpop.permute.xlu1 %884 }
 0x6c7   :  { %1867 = vpow2.f32 %v872_v8  ;;  %v870_v10 = vmul.f32 1.442695, %v868_v9 }
 0x6c9   :  { %1869 = vpow2.f32 %v870_v10  ;;  %v1388_v10 = vld [vmem:[%s2256_s5 + $0x18] sm:$0xff] }
 0x6ca   :  { %1800 = vmatprep.subr.mxu0 %v1388_v10 }
 0x6cb   :  { %1801 = vmatpush3.msra.mxu0 %v1388_v10 }
 0x6d4   :  { %v1868_v11 = vpop.eup %1867 }
 0x6d5   :  { %v877_v12 = vsel %vm297_vm2, %v1868_v11, 0.0 }
 0x6d6   :  { %v1870_v13 = vpop.eup %1869  ;;  %878 = vadd.xlane.f32.xlu0 %v877_v12  ;;  %v1386_v12 = vld [vmem:[%s2256_s5 + $0x8] sm:$0xff] }
 0x6d7   :  { %v874_v14 = vsel %vm297_vm2, %v1870_v13, 0.0 }
 0x6da   :  { %875 = vadd.xlane.f32.xlu0 %v874_v14 }
 0x6f0   :  { %886 = vrot.lane.b32.xlu0 %v2075_v36, %s1991_s14 }
 0x6f7   :  { %v1148_v15 = vpop.xlane.xlu1 %1147 }
 0x6f8   :  { %v1152_v16 = vsub.f32 %v1138_v3, %v1148_v15 }
 0x6fa   :  { %v1154_v17 = vmul.f32 1.442695, %v1152_v16 }
 0x6fc   :  { %1871 = vpow2.f32 %v1154_v17 }
 0x709   :  { %v1872_v20 = vpop.eup %1871 }
 0x70a   :  { %v1158_v21 = vsel %vm297_vm2, %v1872_v20, 0.0 }
 0x70f   :  { %1150 = vmax.xlane.f32.xlu0 %v1149_v19 }
 0x713   :  { %1159 = vadd.xlane.f32.xlu0 %v1158_v21 }
 0x729   :  { %1170 = vrot.lane.b32.xlu0 %v2075_v36, %s1992_s15 }
 0x75f   :  { %v879_v22 = vpop.xlane.xlu0 %878 }
 0x760   :  { %1873 = vrcp.f32 %v879_v22 }
 0x763   :  { %v876_v23 = vpop.xlane.xlu0 %875 }
 0x764   :  { %1875 = vrcp.f32 %v876_v23 }
 0x767   :  { %v887_v24 = vpop.permute.xlu0 %886 }
 0x768   :  { %1769 = vmatprep.subr.mxu1 %v887_v24 }
 0x769   :  { %1770 = vmatpush3.msra.mxu1 %v887_v24 }
 0x76a   :  { %1771 = vmatprep.subr.mxu1 %v885_v47 }
 0x76b   :  { %1772 = vmatpush3.msra.mxu1 %v885_v47 }
 0x76c   :  { %1776 = vmatprep.subr.mxu1 %v971_v45 }
 0x76d   :  { %v1874_v25 = vpop.eup %1873 }
 0x76e   :  { %v883_v28 = vmul.f32 %v1874_v25, %v1868_v11  ;;  %v1387_v11 = vld [vmem:[%s2256_s5 + $0x10] sm:$0xff] }
 0x76f   :  { %1802 = vmatprep.subr.mxu0 %v1387_v11 }
 0x770   :  { %1803 = vmatpush3.msra.mxu0 %v1387_v11 }
 0x771   :  { %v1876_v26 = vpop.eup %1875  ;;  %1804 = vmatprep.subr.mxu0 %v1386_v12 }
 0x772   :  { %v882_v27 = vmul.f32 %v1876_v26, %v1870_v13  ;;  %v1385_v13 = vld [vmem:[%s2256_s5] sm:$0xff]  ;;  %1805 = vmatpush3.msra.mxu0 %v1386_v12 }
 0x773   :  { %1806 = vmatprep.subr.mxu0 %v1385_v13 }
 0x774   :  { %1773 = vmatprep.mubr.msk.f32.mxu1 %vm297_vm2, %v882_v27  ;;  %1807 = vmatpush3.msra.mxu0 %v1385_v13 }
 0x775   :  { %1774 = vmatmul.mubr.msk.f32.vlgmr.msra.gmra.mxu1 %vm297_vm2, %v883_v28  ;;  %v1492_v28 = vld [vmem:[%s2257_s6 + $0x38] sm:$0xff] }
 0x776   :  { %1777 = vmatpush3.msra.mxu1 %v971_v45  ;;  %v1640_v45 = vld [vmem:[#allocation7 + $0x3] ss:$0 sm:$0xff] }
 0x798   :  { %v1151_v36 = vpop.xlane.xlu0 %1150 }
 0x799   :  { %v1153_v29 = vsub.f32 %v1143_v18, %v1151_v36  ;;  %v1491_v36 = vld [vmem:[%s2257_s6 + $0x30] sm:$0xff] }
 0x79b   :  { %v1156_v30 = vmul.f32 1.442695, %v1153_v29  ;;  %v1490_v29 = vld [vmem:[%s2257_s6 + $0x28] sm:$0xff] }
 0x79c   :  { %v1160_v31 = vpop.xlane.xlu0 %1159 }
 0x79d   :  { %1877 = vpow2.f32 %v1156_v30  ;;  %v1489_v30 = vld [vmem:[%s2257_s6 + $0x20] sm:$0xff] }
 0x79e   :  { %1879 = vrcp.f32 %v1160_v31  ;;  %v1488_v31 = vld [vmem:[%s2257_s6 + $0x18] sm:$0xff] }
 0x7a0   :  { %v1171_v32 = vpop.permute.xlu0 %1170 }
 0x7a1   :  { %1788 = vmatprep.subr.mxu1 %v1171_v32 }
 0x7aa   :  { %v1878_v33 = vpop.eup %1877 }
 0x7ab   :  { %v1161_v34 = vsel %vm297_vm2, %v1878_v33, 0.0  ;;  %v1880_v35 = vpop.eup %1879 }
 0x7ac   :  { %1162 = vadd.xlane.f32.xlu1 %v1161_v34  ;;  %v1166_v41 = vmul.f32 %v1880_v35, %v1872_v20  ;;  %v1639_v20 = vld [vmem:[#allocation7 + $0x2] ss:$0 sm:$0xff]  ;;  %v1641_v35 = vld [vmem:[#allocation7 + $0x7] ss:$0 sm:$0xff] }
 0x7ad   :  { %v1485_v34 = vld [vmem:[%s2257_s6] sm:$0xff] }
 0x7bd   :  { %1168 = vrot.lane.b32.xlu1 %v2077_v38, %s1992_s15  ;;  %v1255_v38 = vld [vmem:[%s2255_s4 + $0x18] sm:$0xff] }
 0x835   :  { %v1775_v37 = vpop.f32.mrf.mxu1  ;;  %v1163_v39 = vpop.xlane.xlu1 %1162 }
 0x836   :  { %1881 = vrcp.f32 %v1163_v39 }
 0x837   :  { %v962_v40 = vpop.f32.mrf.mxu1 }
 0x838   :  { %1778 = vmatprep.mubr.msk.f32.mxu1 %vm213_vm1, %v962_v40 }
 0x839   :  { %1779 = vmatmul.mubr.msk.f32.vlgmr.msra.gmra.mxu1 %vm213_vm1, %v1775_v37  ;;  %v1169_v42 = vpop.permute.xlu1 %1168 }
 0x83a   :  { %1789 = vmatpush3.msra.mxu1 %v1171_v32  ;;  %1792 = vmatprep.mubr.msk.f32.mxu1 %vm297_vm2, %v1166_v41  ;;  %v1487_v32 = vld [vmem:[%s2257_s6 + $0x10] sm:$0xff] }
 0x83b   :  { %1790 = vmatprep.subr.mxu1 %v1169_v42 }
 0x83c   :  { %1791 = vmatpush3.msra.mxu1 %v1169_v42 }
 0x83d   :  { %1795 = vmatprep.subr.mxu1 %v1255_v38 }
 0x843   :  { %v1882_v43 = vpop.eup %1881 }
 0x844   :  { %v1167_v44 = vmul.f32 %v1882_v43, %v1878_v33  ;;  %v1486_v33 = vld [vmem:[%s2257_s6 + $0x8] sm:$0xff]  ;;  %s1993_s6 = smov [#allocation8]  }
 0x845   :  { %s1588_s16 = sshll.u32 %s1993_s6, 4  ;;  %s1589_s16 = int_to_ptr.vmem [resolvable:$true] %s1588_s16 }
 0x846   :  { %1793 = vmatmul.mubr.msk.f32.vlgmr.msra.gmra.mxu1 %vm297_vm2, %v1167_v44  ;;  %s1951_s0 = scalar_lea.vmem %s1589_s16, 256  ;;  %p1956_p2 = scmp.lt.s32.totalorder %s1589_s16, %s1589_s16 }
 0x847   :  { %1796 = vmatpush3.msra.mxu1 %v1255_v38  ;;  %p1952_p1 = scmp.ne.s32.totalorder %s1589_s16, %s1951_s0  ;;  %p1957_p3 = scmp.lt.s32.totalorder %s1951_s0, %s1951_s0 }
 0x848   :  { %1811 = vmatprep.subr.mxu1 %v1492_v28 }
 0x849   :  { %p1958_p4 = por %p1957_p3, %p1956_p2 }
 0x84b   :  { %p1959_p5 = pnand %p1958_p4, %p1952_p1 }
 0x8f9   :  { %v1780_v46 = vpop.f32.mrf.mxu1 }
 0x8fa   :  { %v1054_v48 = vadd.f32 %v1780_v46, %v2153_v54 }
 0x8fb   :  { %v1044_v49 = vpop.f32.mrf.mxu1 }
 0x8fc   :  { %v1053_v50 = vadd.f32 %v1044_v49, %v2155_v56 }
 0x906   :  { %v1794_v51 = vpop.f32.mrf.mxu1 }
 0x908   :  { %v1246_v52 = vpop.f32.mrf.mxu1 }
 0x909   :  { %1797 = vmatprep.mubr.msk.f32.mxu1 %vm213_vm1, %v1246_v52 }
 0x90a   :  { %1798 = vmatmul.mubr.msk.f32.vlgmr.msra.gmra.mxu1 %vm213_vm1, %v1794_v51 }
 0x90b   :  { %1812 = vmatpush3.msra.mxu1 %v1492_v28 }
 0x90c   :  { %1813 = vmatprep.subr.mxu1 %v1491_v36 }
 0x90d   :  { %1814 = vmatpush3.msra.mxu1 %v1491_v36 }
 0x90e   :  { %1815 = vmatprep.subr.mxu1 %v1490_v29 }
 0x90f   :  { %1816 = vmatpush3.msra.mxu1 %v1490_v29 }
 0x910   :  { %1817 = vmatprep.subr.mxu1 %v1489_v30 }
 0x911   :  { %1818 = vmatpush3.msra.mxu1 %v1489_v30 }
 0x912   :  { %1819 = vmatprep.subr.mxu1 %v1488_v31 }
 0x913   :  { %1820 = vmatpush3.msra.mxu1 %v1488_v31 }
 0x914   :  { %1821 = vmatprep.subr.mxu1 %v1487_v32 }
 0x915   :  { %1822 = vmatpush3.msra.mxu1 %v1487_v32 }
 0x916   :  { %1823 = vmatprep.subr.mxu1 %v1486_v33 }
 0x917   :  { %1824 = vmatpush3.msra.mxu1 %v1486_v33 }
 0x918   :  { %1825 = vmatprep.subr.mxu1 %v1485_v34 }
 0x919   :  { %1826 = vmatpush3.msra.mxu1 %v1485_v34 }
 0x9ca   :  { %v1799_v53 = vpop.f32.mrf.mxu1 }
 0x9cb   :  { %v1338_v55 = vadd.f32 %v1799_v53, %v1054_v48  ;;  %v1644_v53 = vld [vmem:[#allocation7 + $0x5] ss:$0 sm:$0xff] }
 0x9cc   :  { %v1328_v58 = vpop.f32.mrf.mxu1 }
 0x9cd   :  { %v1340_v59 = vadd.f32 %v1338_v55, %v2051_v1  ;;  %v1337_v60 = vadd.f32 %v1328_v58, %v1053_v50 }
 0x9cf   :  { %v2190_v61 = vadd.f32 %v1638_v57, %v1340_v59  ;;  %v1339_v54 = vadd.f32 %v1337_v60, %v2049_v0 }
 0x9d1   :  { %v2193_v62 = vadd.f32 %v1638_v57, %v1339_v54  ;;  %v1350_v56 = vsel %vm78_vm0, %v2190_v61, 0.0 }
 0x9d2   :  { %1351 = vadd.xlane.f32.xlu0 %v1350_v56 }
 0x9d3   :  { %v1347_v63 = vsel %vm78_vm0, %v2193_v62, 0.0 }
 0x9d4   :  { %1348 = vadd.xlane.f32.xlu1 %v1347_v63 }
 0xa5b   :  { %v1352_v2 = vpop.xlane.xlu0 %1351 }
 0xa5c   :  { %v1354_v3 = vmul.f32 0.03125, %v1352_v2 }
 0xa5d   :  { %v1349_v4 = vpop.xlane.xlu1 %1348 }
 0xa5e   :  { %v1356_v1 = vsub.f32 %v2190_v61, %v1354_v3  ;;  %v1353_v5 = vmul.f32 0.03125, %v1349_v4 }
 0xa60   :  { %v1355_v6 = vsub.f32 %v2193_v62, %v1353_v5  ;;  %v1358_v7 = vmul.f32 %v1356_v1, %v1356_v1 }
 0xa62   :  { %v1362_v0 = vsel %vm78_vm0, %v1358_v7, 0.0  ;;  %v1357_v8 = vmul.f32 %v1355_v6, %v1355_v6 }
 0xa63   :  { %1363 = vadd.xlane.f32.xlu1 %v1362_v0 }
 0xa64   :  { %v1359_v9 = vsel %vm78_vm0, %v1357_v8, 0.0 }
 0xa65   :  { %1360 = vadd.xlane.f32.xlu0 %v1359_v9 }
 0xaec   :  { %v1364_v14 = vpop.xlane.xlu1 %1363 }
 0xaed   :  { %v1366_v47 = vmul.f32 0.03125, %v1364_v14 }
 0xaee   :  { %v1361_v15 = vpop.xlane.xlu0 %1360 }
 0xaef   :  { %v1368_v16 = vadd.f32 1e-05, %v1366_v47  ;;  %v1365_v17 = vmul.f32 0.03125, %v1361_v15 }
 0xaf1   :  { %1883 = vrsqrt.f32 %v1368_v16  ;;  %v1367_v18 = vadd.f32 1e-05, %v1365_v17 }
 0xaf3   :  { %1885 = vrsqrt.f32 %v1367_v18 }
 0xafe   :  { %v1884_v19 = vpop.eup %1883 }
 0xaff   :  { %v1372_v21 = vmul.f32 %v1884_v19, %v1356_v1 }
 0xb00   :  { %v1886_v22 = vpop.eup %1885 }
 0xb01   :  { %v1371_v23 = vmul.f32 %v1886_v22, %v1355_v6  ;;  %v1378_v24 = vmul.f32 %v1639_v20, %v1372_v21 }
 0xb03   :  { %v1377_v25 = vmul.f32 %v1639_v20, %v1371_v23  ;;  %v1384_v27 = vadd.f32 %v1640_v45, %v1378_v24 }
 0xb05   :  { %v1383_v26 = vadd.f32 %v1640_v45, %v1377_v25 }
 0xb07   :  { %1808 = vmatprep.mubr.msk.f32.mxu0 %vm78_vm0, %v1383_v26 }
 0xb08   :  { %1809 = vmatmul.mubr.msk.f32.vlgmr.msra.gmra.mxu0 %vm78_vm0, %v1384_v27 }
 0xbc8   :  { %v1810_v37 = vpop.f32.mrf.mxu0 }
 0xbc9   :  { %v1471_v39 = vadd.f32 %v1810_v37, %v1641_v35 }
 0xbca   :  { %v1465_v40 = vpop.f32.mrf.mxu0 }
 0xbcb   :  { %v1478_v41 = vmul.f32 0.70710677, %v1471_v39  ;;  %v1466_v42 = vadd.f32 %v1641_v35, %v1465_v40  ;;  %v1475_v50 = vmul.f32 0.5, %v1471_v39 }
 0xbcd   :  { %1887 = verf.f32 %v1478_v41  ;;  %v1477_v43 = vmul.f32 0.70710677, %v1466_v42  ;;  %v1474_v48 = vmul.f32 0.5, %v1466_v42 }
 0xbcf   :  { %1889 = verf.f32 %v1477_v43 }
 0xbda   :  { %v1888_v44 = vpop.eup %1887 }
 0xbdb   :  { %v1482_v46 = vadd.f32 1.0, %v1888_v44 }
 0xbdc   :  { %v1890_v38 = vpop.eup %1889 }
 0xbdd   :  { %v1481_v49 = vadd.f32 1.0, %v1890_v38  ;;  %v1484_v52 = vmul.f32 %v1482_v46, %v1475_v50 }
 0xbdf   :  { %v1483_v51 = vmul.f32 %v1481_v49, %v1474_v48 }
 0xbe1   :  { %1827 = vmatprep.mubr.msk.f32.mxu1 %vm1497_vm3, %v1483_v51 }
 0xbe2   :  { %1828 = vmatmul.mubr.msk.f32.vlgmr.msra.gmra.mxu1 %vm1497_vm3, %v1484_v52 }
 0xca2   :  { %v1829_v55 = vpop.f32.mrf.mxu1 }
 0xca3   :  { %v1576_v57 = vadd.f32 %v1829_v55, %v1644_v53 }
 0xca4   :  { %v1570_v58 = vpop.f32.mrf.mxu1 }
 0xca5   :  { %v1580_v59 = vadd.f32 %v1576_v57, %v2190_v61  ;;  %v1571_v60 = vadd.f32 %v1644_v53, %v1570_v58 }
 0xca7   :  { %1582 = vst.msk [vmem:[#allocation8 + $0x8] sm:$0xff] %vm78_vm0, %v1580_v59  ;;  %v1579_v54 = vadd.f32 %v1571_v60, %v2193_v62 }
 0xca9   :  { %1581 = vst.msk [vmem:[#allocation8] sm:$0xff] %vm78_vm0, %v1579_v54 }
 0xcaa   :  { %1962 = shalt.err (!%p1959_p5)
}
 0xcab   :  { %1594 = dma.vmem_to_hbm [thread:$0]  %s1589_s16, 256, %s2258_s7, [#allocation4], %s1979_s29, %s1979_s29, %s1980_s30  }
 0xcac   :  { %1975 = dma.done.wait [#allocation4], 256  }
 0xcad   :  { %1976 = vsyncadd [#allocation4], 4294967040 }
 0xcae   :  { %1598 = vsyncpa [#allocation3], 1 }
 0xcaf   :  { %1599 = vsyncpa [#allocation6], 1 }
 0xcb0   :  { %1600 = vsyncpa [#allocation4], 1 }

</bundles_post_ra>
